<compile_context>
chip_gen: v5e
topology: v5e:2x2
jax: 0.10.0
libtpu: 0.0.40
codegen_flags: <defaults>
</compile_context>

<pallas_src>
import functools

import jax
import jax.numpy as jnp
from jax.experimental import pallas as pl
from jax.experimental.pallas import tpu as pltpu


def _accumulate_tile(preds_ref, gts_ref, inter_acc, card_acc, *,
                     n_chunks, unroll, masked, tile_start, hw):
    """Fused per-chunk stats for one (C, tn) pixel tile.

    preds_ref : (C, tn)   logits (caller dtype; cast to f32 per chunk)
    gts_ref   : (1, tn)   int8/int32 labels (ignore mapped to -1)
    inter_acc : (C, 128)  f32 VMEM lane-partial accumulator (intersection)
    card_acc  : (C, 128)  f32 VMEM lane-partial accumulator (cardinality)
    """
    c = preds_ref.shape[0]
    # Hoisted once per tile and reused across chunks (JAX doesn't CSE broadcast_in_dim).
    class_ids = jax.lax.broadcasted_iota(jnp.int32, (c, 128), 0)

    def body(k, carry):
        ip, cp = carry
        off = pl.multiple_of(k * 128, 128)
        logits = preds_ref[:, pl.ds(off, 128)].astype(jnp.float32)       # (C,128)
        g = gts_ref[:, pl.ds(off, 128)].astype(jnp.int32)                # (1,128)

        # softmax over the class (sublane) axis == log_softmax(...).exp()
        m = jnp.max(logits, axis=0, keepdims=True)                       # (1,128)
        e = jnp.exp(logits - m)
        inv = pl.reciprocal(jnp.sum(e, axis=0, keepdims=True), approx=False)
        probs = e * inv                                                  # (C,128)

        if masked:
            # Ragged / out-of-range lanes: confine garbage with where (not multiply).
            lane = jax.lax.broadcasted_iota(jnp.int32, (1, 128), 1)
            valid = (tile_start + off + lane) < hw                       # (1,128) bool
            g = jnp.where(valid, g, -1)
            probs = jnp.where(valid, probs, 0.0)

        # ignore_index (-1) never matches any class id -> all-zero one-hot row,
        # matching the one_hot(num_classes+1)[..., :-1] trick of the reference.
        onehot = g == class_ids                                          # (C,128) bool
        ip = ip + jnp.where(onehot, probs, 0.0)                          # intersection
        cp = cp + (probs + onehot.astype(jnp.float32))                   # cardinality
        return ip, cp

    zeros = jnp.zeros((c, 128), jnp.float32)
    ip, cp = jax.lax.fori_loop(0, n_chunks, body, (zeros, zeros), unroll=unroll)
    inter_acc[...] += ip
    card_acc[...] += cp


def _dice_stats_kernel(preds_ref, gts_ref, out_ref, inter_acc, card_acc, *,
                       tn, hw, n_chunks, unroll, may_mask):
    """One grid step = one (C, tn) pixel tile of one (image, pixel-split) pair.

    out_ref : (2, C) f32 per-(image, split) partials; row 0 = intersection, row 1 = card.
    """
    s = pl.program_id(1)                 # pixel-split index (core-parallel on v7x)
    i = pl.program_id(2)                 # tile index within the split (reduction axis)
    tps = pl.num_programs(2)

    @pl.when(i == 0)
    def _():
        inter_acc[...] = jnp.zeros_like(inter_acc)
        card_acc[...] = jnp.zeros_like(card_acc)

    tile_start = (s * tps + i) * tn      # logical pixel offset of this tile

    run = functools.partial(_accumulate_tile, preds_ref, gts_ref, inter_acc, card_acc,
                            n_chunks=n_chunks, unroll=unroll,
                            tile_start=tile_start, hw=hw)

    if not may_mask:
        # Trace-time decision: every logical tile lies fully inside the image.
        run(masked=False)
    else:
        needs_mask = tile_start + tn > hw

        @pl.when(jnp.logical_not(needs_mask))
        def _():
            run(masked=False)            # interior tiles: unmasked fast path

        @pl.when(needs_mask)
        def _():
            run(masked=True)             # ragged / fully-out-of-range logical tiles

    @pl.when(i == tps - 1)
    def _():
        # Deferred cross-lane reduction: one XLU reduce per (image, split).
        out_ref[0, :] = jnp.sum(inter_acc[...], axis=1)
        out_ref[1, :] = jnp.sum(card_acc[...], axis=1)


def _nearest_resize_labels(gts, out_h, out_w):
    """torchvision/torch nearest resize (floor(dst_idx * src/dst)) for (B,1,Hg,Wg) labels."""
    # TODO(synk): data-dependent gather for the nearest-neighbor resize stays as tiny JAX
    # glue on the small integer label map (no clean in-kernel equivalent needed).
    b, _, hg, wg = gts.shape
    rows = jnp.floor(jnp.arange(out_h) * (hg / out_h)).astype(jnp.int32)
    cols = jnp.floor(jnp.arange(out_w) * (wg / out_w)).astype(jnp.int32)
    g = gts[:, 0]                  # (B, Hg, Wg)
    return g[:, rows, :][:, :, cols]


def _vmem_capacity_bytes():
    try:
        info = pltpu.get_tpu_info()
        cap = getattr(info, "vmem_capacity_bytes", None)
        if cap:
            return int(cap)
    except Exception:
        pass
    return 64 * 1024 * 1024        # conservative fallback: v7x per-TensorCore VMEM


def deeplab_v1_dice_loss(preds, gts, *, num_classes, ignore_index=-1,
                         smooth=0.0, eps=1e-7, tn=None):
    """DeepLabv1Loss(name='dice', weight=None, reduction='mean') forward."""
    B, C, H, W = preds.shape
    assert C == num_classes
    if B == 0:
        return jnp.float32(0.0)
    hw = H * W

    # --- glue: nearest resize of gts to preds' spatial size (small int tensor) ---
    gts_r = _nearest_resize_labels(gts.astype(jnp.int32), H, W)          # (B, H, W)
    # Normalize the ignore sentinel to -1 (note: raw -1 labels with ignore_index != -1
    # would also be treated as ignored; the PyTorch reference would error on them anyway).
    gts_r = jnp.where(gts_r == ignore_index, -1, gts_r)
    label_dtype = jnp.int8 if num_classes <= 127 else jnp.int32          # narrow label stream
    gts_flat = gts_r.reshape(B, 1, hw).astype(label_dtype)

    # --- free reshape: NCHW -> (B, C, H*W); keep caller dtype (bf16 stays bf16) ---
    preds_flat = preds.reshape(B, C, hw)

    # --- generation-aware tile / VMEM budget (pure byte budgeting, no lane cap) ---
    vmem_cap = _vmem_capacity_bytes()
    if vmem_cap >= 100 * 1024 * 1024:       # v5e / v6e: 128 MiB physical VMEM
        target_tile_bytes = 8 * 1024 * 1024
        vmem_limit = 64 * 1024 * 1024
    else:                                   # v7x: 64 MiB per TensorCore
        target_tile_bytes = 4 * 1024 * 1024
        vmem_limit = 40 * 1024 * 1024

    hw_pad = ((hw + 127) // 128) * 128
    if tn is None:
        per_pixel = C * preds.dtype.itemsize + jnp.dtype(label_dtype).itemsize
        tn = max(128, (target_tile_bytes // per_pixel) // 128 * 128)
    assert tn % 128 == 0 and tn >= 128
    tn = min(tn, hw_pad)                    # never larger than one (padded) image

    n_tiles = pl.cdiv(hw, tn)
    # Core-parallel split of the pixel axis (keeps both v7x TensorCores busy even at B=1;
    # on single-TC chips it is just a loop split).
    ns = 2 if n_tiles >= 2 else 1
    if ns > 1 and n_tiles % ns != 0:
        # Re-pick tn so the tile count divides the split -> avoids wasted OOB tile DMAs.
        tgt = ((n_tiles + ns - 1) // ns) * ns
        tn = min(hw_pad, max(128, ((pl.cdiv(hw, tgt) + 127) // 128) * 128))
        n_tiles = pl.cdiv(hw, tn)
    tps = pl.cdiv(n_tiles, ns)              # tiles per split
    n_chunks = tn // 128
    unroll = max(1, min(8, n_chunks))
    may_mask = (ns * tps * tn) != hw        # trace-time: can any logical tile cross hw?
    last_block = n_tiles - 1

    kernel = functools.partial(_dice_stats_kernel, tn=tn, hw=hw, n_chunks=n_chunks,
                               unroll=unroll, may_mask=may_mask)

    def pix_map(b, s, i):
        # Clamp so a logical tile past the end re-reads a valid tile (masked to zero).
        return (b, 0, jnp.minimum(s * tps + i, last_block))

    # NOTE: with byte-budgeted tiles the default double-buffering is enough; Buffered(3)
    # would only matter for user-forced tiny tn.
    stats = pl.pallas_call(
        kernel,
        out_shape=jax.ShapeDtypeStruct((B, ns, 2, C), jnp.float32),
        grid_spec=pltpu.PrefetchScalarGridSpec(
            num_scalar_prefetch=0,
            grid=(B, ns, tps),
            in_specs=[
                pl.BlockSpec((None, C, tn), pix_map),    # full class extent (exempt dim)
                pl.BlockSpec((None, 1, tn), pix_map),
            ],
            out_specs=pl.BlockSpec((None, None, 2, C), lambda b, s, i: (b, s, 0, 0)),
            scratch_shapes=[pltpu.VMEM((C, 128), jnp.float32),
                            pltpu.VMEM((C, 128), jnp.float32)],
        ),
        compiler_params=pltpu.CompilerParams(
            dimension_semantics=("parallel", "parallel", "arbitrary"),
            vmem_limit_bytes=vmem_limit,
        ),
    )(preds_flat, gts_flat)

    # --- glue: combine per-(image, split) partials and finish the dice loss (tiny) ---
    intersection = jnp.sum(stats[:, :, 0, :], axis=(0, 1))               # (C,)
    cardinality = jnp.sum(stats[:, :, 1, :], axis=(0, 1))                # (C,)
    dice = jnp.maximum((2.0 * intersection + smooth) / (cardinality + smooth), eps)
    loss = 1.0 - dice                  # log_loss=False, weights=None, log_cosh=False
    return jnp.mean(loss)              # reduction='mean', normalize=False


def _reference_loss(preds, gts, *, num_classes, ignore_index=-1, smooth=0.0, eps=1e-7):
    """Pure-JAX reference of the same forward (sanity check)."""
    B, C, H, W = preds.shape
    g = _nearest_resize_labels(gts.astype(jnp.int32), H, W)              # (B,H,W)
    probs = jax.nn.softmax(preds.astype(jnp.float32), axis=1)            # (B,C,H,W)
    onehot = jax.nn.one_hot(jnp.where(g == ignore_index, num_classes, g),
                            num_classes + 1)[..., :-1]                   # (B,H,W,C)
    onehot = jnp.transpose(onehot, (0, 3, 1, 2))                         # (B,C,H,W)
    inter = jnp.sum(onehot * probs, axis=(0, 2, 3))
    card = jnp.sum(onehot + probs, axis=(0, 2, 3))
    dice = jnp.maximum((2.0 * inter + smooth) / (card + smooth), eps)
    return jnp.mean(1.0 - dice)


if __name__ == "__main__":
    key = jax.random.PRNGKey(0)
    ks = jax.random.split(key, 9)

    # Case 1: default byte-budgeted tile (-> single tile), f32, B=2, gts at 2x resolution.
    B, C, H, W = 2, 4, 16, 16
    preds = jax.random.normal(ks[0], (B, C, H, W), dtype=jnp.float32)
    gts = jax.random.randint(ks[1], (B, 1, 32, 32), 0, C, dtype=jnp.int32)
    gts = jnp.where(jax.random.bernoulli(ks[2], 0.05, gts.shape), -1, gts)
    loss = jax.block_until_ready(deeplab_v1_dice_loss(preds, gts, num_classes=C))
    ref = jax.block_until_ready(_reference_loss(preds, gts, num_classes=C))
    assert jnp.isfinite(loss)
    assert jnp.allclose(loss, ref, rtol=1e-4, atol=1e-5), (loss, ref)

    # Case 2: ragged final tile + 2-way pixel split + C not a multiple of 8 + B=1.
    B2, C2, H2, W2 = 1, 3, 12, 12
    preds2 = jax.random.normal(ks[3], (B2, C2, H2, W2), dtype=jnp.float32)
    gts2 = jax.random.randint(ks[4], (B2, 1, 24, 24), 0, C2, dtype=jnp.int32)
    gts2 = jnp.where(jax.random.bernoulli(ks[5], 0.1, gts2.shape), -1, gts2)
    loss2 = jax.block_until_ready(
        deeplab_v1_dice_loss(preds2, gts2, num_classes=C2, tn=128))
    ref2 = jax.block_until_ready(_reference_loss(preds2, gts2, num_classes=C2))
    assert jnp.isfinite(loss2)
    assert jnp.allclose(loss2, ref2, rtol=1e-4, atol=1e-5), (loss2, ref2)

    # Case 3: bf16 logits + odd tile count (exercises the clamped fully-OOB logical tile).
    B3, C3, H3, W3 = 2, 5, 16, 24
    preds3 = jax.random.normal(ks[6], (B3, C3, H3, W3), dtype=jnp.bfloat16)
    gts3 = jax.random.randint(ks[7], (B3, 1, 16, 24), 0, C3, dtype=jnp.int32)
    gts3 = jnp.where(jax.random.bernoulli(ks[8], 0.1, gts3.shape), -1, gts3)
    loss3 = jax.block_until_ready(
        deeplab_v1_dice_loss(preds3, gts3, num_classes=C3, tn=128))
    ref3 = jax.block_until_ready(_reference_loss(preds3, gts3, num_classes=C3))
    assert jnp.isfinite(loss3)
    assert jnp.allclose(loss3, ref3, rtol=1e-4, atol=1e-4), (loss3, ref3)

    print("KERNEL_OK")
</pallas_src>

<mosaic_0001>
module attributes {stable_mosaic.version = 11 : i64} {
  func.func @_dice_stats_kernel(%arg0: i32, %arg1: i32, %arg2: i32, %arg3: memref<1x4x256xf32, #tpu.memory_space<vmem>>, %arg4: memref<1x1x256xi8, #tpu.memory_space<vmem>>, %arg5: memref<1x1x2x4xf32, #tpu.memory_space<vmem>>, %arg6: memref<4x128xf32, #tpu.memory_space<vmem>>, %arg7: memref<4x128xf32, #tpu.memory_space<vmem>>) attributes {dimension_semantics = [#tpu.dimension_semantics<parallel>, #tpu.dimension_semantics<parallel>, #tpu.dimension_semantics<arbitrary>], iteration_bounds = array<i64: 2, 1, 1>, scalar_prefetch = 0 : i64, scratch_operands = 2 : i64, tpu.core_type = #tpu.core_type<tc>, window_params = [{transform_indices = @transform_0, window_bounds = array<i64: 1, 4, 256>}, {transform_indices = @transform_1, window_bounds = array<i64: 1, 1, 256>}, {transform_indices = @transform_2, window_bounds = array<i64: 1, 1, 2, 4>}]} {
    %c0_i32 = arith.constant 0 : i32
    %0 = arith.cmpi eq, %arg2, %c0_i32 : i32
    %1 = arith.extui %0 : i1 to i32
    %c0_i32_0 = arith.constant 0 : i32
    %2 = arith.cmpi ne, %1, %c0_i32_0 : i32
    scf.if %2 {
      %cst_26 = arith.constant 0.000000e+00 : f32
      %70 = vector.broadcast %cst_26 : f32 to vector<4x128xf32>
      %c0_27 = arith.constant 0 : index
      %c0_28 = arith.constant 0 : index
      %71 = vector.load %arg6[%c0_27, %c0_28] : memref<4x128xf32, #tpu.memory_space<vmem>>, vector<4x128xf32>
      tpu.vector_store %arg6[%c0_27, %c0_28], %70 {strides = array<i32>} : memref<4x128xf32, #tpu.memory_space<vmem>>, vector<4x128xf32>,
      %cst_29 = arith.constant 0.000000e+00 : f32
      %72 = vector.broadcast %cst_29 : f32 to vector<4x128xf32>
      %c0_30 = arith.constant 0 : index
      %c0_31 = arith.constant 0 : index
      %73 = vector.load %arg7[%c0_30, %c0_31] : memref<4x128xf32, #tpu.memory_space<vmem>>, vector<4x128xf32>
      tpu.vector_store %arg7[%c0_30, %c0_31], %72 {strides = array<i32>} : memref<4x128xf32, #tpu.memory_space<vmem>>, vector<4x128xf32>,
    } else {
    }
    %3 = tpu.iota {dimensions = array<i32: 0>} : vector<4x128xi32>
    %cst = arith.constant 0.000000e+00 : f32
    %4 = vector.broadcast %cst : f32 to vector<4x128xf32>
    %c0_i32_1 = arith.constant 0 : i32
    %c128_i32 = arith.constant 128 : i32
    %5 = arith.muli %c0_i32_1, %c128_i32 : i32
    %6 = tpu.assume_multiple %5, 128 : i32
    %c0 = arith.constant 0 : index
    %c0_2 = arith.constant 0 : index
    %7 = arith.index_cast %6 : i32 to index
    %8 = vector.load %arg3[%c0, %c0_2, %7] : memref<1x4x256xf32, #tpu.memory_space<vmem>>, vector<1x4x128xf32>
    %9 = vector.shape_cast %8 : vector<1x4x128xf32> to vector<4x128xf32>
    %c0_3 = arith.constant 0 : index
    %c0_4 = arith.constant 0 : index
    %10 = arith.index_cast %6 : i32 to index
    %11 = vector.load %arg4[%c0_3, %c0_4, %10] : memref<1x1x256xi8, #tpu.memory_space<vmem>>, vector<1x1x128xi8>
    %12 = vector.shape_cast %11 : vector<1x1x128xi8> to vector<1x128xi8>
    %13 = arith.extsi %12 : vector<1x128xi8> to vector<1x128xi32>
    %cst_5 = arith.constant dense<0xFF800000> : vector<128xf32>
    %14 = vector.multi_reduction <maximumf>, %9, %cst_5 [0] : vector<4x128xf32> to vector<128xf32>
    %15 = vector.shape_cast %14 : vector<128xf32> to vector<1x128xf32>
    %16 = vector.broadcast %15 : vector<1x128xf32> to vector<4x128xf32>
    %17 = arith.subf %9, %16 : vector<4x128xf32>
    %18 = math.exp %17 : vector<4x128xf32>
    %cst_6 = arith.constant dense<0.000000e+00> : vector<128xf32>
    %19 = vector.multi_reduction <add>, %18, %cst_6 [0] : vector<4x128xf32> to vector<128xf32>
    %20 = vector.shape_cast %19 : vector<128xf32> to vector<1x128xf32>
    %21 = tpu.reciprocal %20 : vector<1x128xf32> -> vector<1x128xf32>
    %22 = vector.broadcast %21 : vector<1x128xf32> to vector<4x128xf32>
    %23 = arith.mulf %18, %22 : vector<4x128xf32>
    %24 = vector.broadcast %13 : vector<1x128xi32> to vector<4x128xi32>
    %25 = arith.cmpi eq, %24, %3 : vector<4x128xi32>
    %cst_7 = arith.constant 0.000000e+00 : f32
    %26 = vector.broadcast %cst_7 : f32 to vector<4x128xf32>
    %27 = arith.select %25, %23, %26 : vector<4x128xi1>, vector<4x128xf32>
    %28 = arith.addf %4, %27 : vector<4x128xf32>
    %29 = arith.extui %25 : vector<4x128xi1> to vector<4x128xi32>
    %30 = arith.sitofp %29 : vector<4x128xi32> to vector<4x128xf32>
    %31 = arith.addf %23, %30 : vector<4x128xf32>
    %32 = arith.addf %4, %31 : vector<4x128xf32>
    %c1_i32 = arith.constant 1 : i32
    %c128_i32_8 = arith.constant 128 : i32
    %33 = arith.muli %c1_i32, %c128_i32_8 : i32
    %34 = tpu.assume_multiple %33, 128 : i32
    %c0_9 = arith.constant 0 : index
    %c0_10 = arith.constant 0 : index
    %35 = arith.index_cast %34 : i32 to index
    %36 = vector.load %arg3[%c0_9, %c0_10, %35] : memref<1x4x256xf32, #tpu.memory_space<vmem>>, vector<1x4x128xf32>
    %37 = vector.shape_cast %36 : vector<1x4x128xf32> to vector<4x128xf32>
    %c0_11 = arith.constant 0 : index
    %c0_12 = arith.constant 0 : index
    %38 = arith.index_cast %34 : i32 to index
    %39 = vector.load %arg4[%c0_11, %c0_12, %38] : memref<1x1x256xi8, #tpu.memory_space<vmem>>, vector<1x1x128xi8>
    %40 = vector.shape_cast %39 : vector<1x1x128xi8> to vector<1x128xi8>
    %41 = arith.extsi %40 : vector<1x128xi8> to vector<1x128xi32>
    %cst_13 = arith.constant dense<0xFF800000> : vector<128xf32>
    %42 = vector.multi_reduction <maximumf>, %37, %cst_13 [0] : vector<4x128xf32> to vector<128xf32>
    %43 = vector.shape_cast %42 : vector<128xf32> to vector<1x128xf32>
    %44 = vector.broadcast %43 : vector<1x128xf32> to vector<4x128xf32>
    %45 = arith.subf %37, %44 : vector<4x128xf32>
    %46 = math.exp %45 : vector<4x128xf32>
    %cst_14 = arith.constant dense<0.000000e+00> : vector<128xf32>
    %47 = vector.multi_reduction <add>, %46, %cst_14 [0] : vector<4x128xf32> to vector<128xf32>
    %48 = vector.shape_cast %47 : vector<128xf32> to vector<1x128xf32>
    %49 = tpu.reciprocal %48 : vector<1x128xf32> -> vector<1x128xf32>
    %50 = vector.broadcast %49 : vector<1x128xf32> to vector<4x128xf32>
    %51 = arith.mulf %46, %50 : vector<4x128xf32>
    %52 = vector.broadcast %41 : vector<1x128xi32> to vector<4x128xi32>
    %53 = arith.cmpi eq, %52, %3 : vector<4x128xi32>
    %cst_15 = arith.constant 0.000000e+00 : f32
    %54 = vector.broadcast %cst_15 : f32 to vector<4x128xf32>
    %55 = arith.select %53, %51, %54 : vector<4x128xi1>, vector<4x128xf32>
    %56 = arith.addf %28, %55 : vector<4x128xf32>
    %57 = arith.extui %53 : vector<4x128xi1> to vector<4x128xi32>
    %58 = arith.sitofp %57 : vector<4x128xi32> to vector<4x128xf32>
    %59 = arith.addf %51, %58 : vector<4x128xf32>
    %60 = arith.addf %32, %59 : vector<4x128xf32>
    %c2_i32 = arith.constant 2 : i32
    %c0_16 = arith.constant 0 : index
    %c0_17 = arith.constant 0 : index
    %61 = vector.load %arg6[%c0_16, %c0_17] : memref<4x128xf32, #tpu.memory_space<vmem>>, vector<4x128xf32>
    %62 = arith.addf %61, %56 : vector<4x128xf32>
    %c0_18 = arith.constant 0 : index
    %c0_19 = arith.constant 0 : index
    %63 = vector.load %arg6[%c0_18, %c0_19] : memref<4x128xf32, #tpu.memory_space<vmem>>, vector<4x128xf32>
    tpu.vector_store %arg6[%c0_18, %c0_19], %62 {strides = array<i32>} : memref<4x128xf32, #tpu.memory_space<vmem>>, vector<4x128xf32>,
    %c0_20 = arith.constant 0 : index
    %c0_21 = arith.constant 0 : index
    %64 = vector.load %arg7[%c0_20, %c0_21] : memref<4x128xf32, #tpu.memory_space<vmem>>, vector<4x128xf32>
    %65 = arith.addf %64, %60 : vector<4x128xf32>
    %c0_22 = arith.constant 0 : index
    %c0_23 = arith.constant 0 : index
    %66 = vector.load %arg7[%c0_22, %c0_23] : memref<4x128xf32, #tpu.memory_space<vmem>>, vector<4x128xf32>
    tpu.vector_store %arg7[%c0_22, %c0_23], %65 {strides = array<i32>} : memref<4x128xf32, #tpu.memory_space<vmem>>, vector<4x128xf32>,
    %c0_i32_24 = arith.constant 0 : i32
    %67 = arith.cmpi eq, %arg2, %c0_i32_24 : i32
    %68 = arith.extui %67 : i1 to i32
    %c0_i32_25 = arith.constant 0 : i32
    %69 = arith.cmpi ne, %68, %c0_i32_25 : i32
    scf.if %69 {
      %c0_26 = arith.constant 0 : index
      %c0_27 = arith.constant 0 : index
      %70 = vector.load %arg6[%c0_26, %c0_27] : memref<4x128xf32, #tpu.memory_space<vmem>>, vector<4x128xf32>
      %cst_28 = arith.constant dense<0.000000e+00> : vector<4xf32>
      %71 = vector.multi_reduction <add>, %70, %cst_28 [1] : vector<4x128xf32> to vector<4xf32>
      %c0_29 = arith.constant 0 : index
      %c0_30 = arith.constant 0 : index
      %c0_31 = arith.constant 0 : index
      %c0_32 = arith.constant 0 : index
      %72 = vector.load %arg5[%c0_29, %c0_30, %c0_31, %c0_32] : memref<1x1x2x4xf32, #tpu.memory_space<vmem>>, vector<1x1x1x4xf32>
      %73 = vector.shape_cast %72 : vector<1x1x1x4xf32> to vector<4xf32>
      %74 = vector.shape_cast %71 : vector<4xf32> to vector<1x1x1x4xf32>
      tpu.vector_store %arg5[%c0_29, %c0_30, %c0_31, %c0_32], %74 {strides = array<i32>} : memref<1x1x2x4xf32, #tpu.memory_space<vmem>>, vector<1x1x1x4xf32>,
      %c0_33 = arith.constant 0 : index
      %c0_34 = arith.constant 0 : index
      %75 = vector.load %arg7[%c0_33, %c0_34] : memref<4x128xf32, #tpu.memory_space<vmem>>, vector<4x128xf32>
      %cst_35 = arith.constant dense<0.000000e+00> : vector<4xf32>
      %76 = vector.multi_reduction <add>, %75, %cst_35 [1] : vector<4x128xf32> to vector<4xf32>
      %c0_36 = arith.constant 0 : index
      %c0_37 = arith.constant 0 : index
      %c1 = arith.constant 1 : index
      %c0_38 = arith.constant 0 : index
      %77 = vector.load %arg5[%c0_36, %c0_37, %c1, %c0_38] : memref<1x1x2x4xf32, #tpu.memory_space<vmem>>, vector<1x1x1x4xf32>
      %78 = vector.shape_cast %77 : vector<1x1x1x4xf32> to vector<4xf32>
      %79 = vector.shape_cast %76 : vector<4xf32> to vector<1x1x1x4xf32>
      tpu.vector_store %arg5[%c0_36, %c0_37, %c1, %c0_38], %79 {strides = array<i32>} : memref<1x1x2x4xf32, #tpu.memory_space<vmem>>, vector<1x1x1x4xf32>,
    } else {
    }
    return
  }
  func.func @transform_0(%arg0: i32, %arg1: i32, %arg2: i32) -> (i32, i32, i32) {
    %c1_i32 = arith.constant 1 : i32
    %0 = arith.muli %arg1, %c1_i32 : i32
    %1 = arith.addi %0, %arg2 : i32
    %c0_i32 = arith.constant 0 : i32
    %2 = arith.minsi %1, %c0_i32 : i32
    %c0_i32_0 = arith.constant 0 : i32
    %c0_i32_1 = arith.constant 0 : i32
    return %arg0, %c0_i32_0, %2 : i32, i32, i32
  }
  func.func @transform_1(%arg0: i32, %arg1: i32, %arg2: i32) -> (i32, i32, i32) {
    %c1_i32 = arith.constant 1 : i32
    %0 = arith.muli %arg1, %c1_i32 : i32
    %1 = arith.addi %0, %arg2 : i32
    %c0_i32 = arith.constant 0 : i32
    %2 = arith.minsi %1, %c0_i32 : i32
    %c0_i32_0 = arith.constant 0 : i32
    %c0_i32_1 = arith.constant 0 : i32
    return %arg0, %c0_i32_0, %2 : i32, i32, i32
  }
  func.func @transform_2(%arg0: i32, %arg1: i32, %arg2: i32) -> (i32, i32, i32, i32) {
    %c0_i32 = arith.constant 0 : i32
    %c0_i32_0 = arith.constant 0 : i32
    %c0_i32_1 = arith.constant 0 : i32
    return %arg0, %arg1, %c0_i32, %c0_i32_0 : i32, i32, i32, i32
  }
}

</mosaic_0001>

<bundles_post_ra>
// kernel: tpu_custom_call.1
= control target key start
LH: loop header
LB: loop body
LE: loop exit
PB: predicated region body
PF: predicated region fallthrough
CT: control target
= control target key end

     0   :  { %7 = vsyncpa [#allocation5], 0  ;;  %s854_s0 = inlined_call_operand.hbm [shape: f32[2,4,256], index: 0, kind: input, shape index: {}]   ;;  %s855_s1 = inlined_call_operand.vmem [shape: s8[2,1,256], index: 1, kind: input, shape index: {}]   ;;  %s856_s2 = inlined_call_operand.hbm [shape: f32[2,1,2,4], index: 2, kind: output, shape index: {}]  }
   0x1   :  { %9 = vsyncpa [#allocation5 + $0x1], 0 }
   0x2   :  { %10 = vsyncpa [#allocation6], 0 }
   0x3   :  { %12 = vsyncpa [#allocation6 + $0x1], 0  ;;  %s717_s9 = smov 0   ;;  %s719_s10 = smov 0  }
   0x4   :  { %s721_s11 = smov 0   ;;  %s723_s12 = smov 0  }
   0x5   :  { %s725_s13 = smov 0   ;;  %s727_s14 = smov 0  }
   0x6 LB: > { %s496_s15 = sadd.s32 4294967295, %s699_s14   ;;  %s497_s16 = sadd.s32 4294967294, %s699_s14   ;;  %s699_s14 = sphi %s727_s14, %s18_s14   ;;  %s695_s13 = sphi %s725_s13, %s865_s13   ;;  %s691_s12 = sphi %s723_s12, %s864_s12   ;;  %s687_s11 = sphi %s721_s11, %s863_s11   ;;  %s683_s10 = sphi %s719_s10, %s862_s10   ;;  %s679_s9 = sphi %s717_s9, %s861_s9  }
   0x7   : > { %s37_s17 = sadd.s32 1, %s695_s13  ;;  %s52_s18 = sadd.s32 1, %s687_s11 }
   0x8   : > { %p39_p0 = scmp.ge.s32.totalorder %s37_s17, 2  ;;  %p59_p1 = scmp.ne.s32.totalorder %s687_s11, %s683_s10 }
   0x9   : > { %p60_p2 = scmp.eq.s32.totalorder %s699_s14, 0  ;;  %p65_p3 = scmp.ne.s32.totalorder %s683_s10, %s679_s9 }
   0xa   : > { %s867_s17 = smov (%p39_p0, %s37_s17), 0  ;;  %p66_p5 = scmp.eq.s32.totalorder %s496_s15, 0 }
   0xb   : > { %p758_p4 = por %p60_p2, %p59_p1  ;;  %s47_s20 = ssub.s32 %s695_s13, %s867_s17 }
   0xc   : > { %p125_p6 = scmp.eq.s32.totalorder %s496_s15, 1  ;;  %p50_p7 = scmp.eq.s32.totalorder %s47_s20, 0 }
   0xd   : > { %p764_p8 = por %p66_p5, %p65_p3  ;;  %p131_p10 = scmp.eq.s32.totalorder %s497_s16, 1 }
   0xe   : > { %p768_p9 = por %p125_p6, %p59_p1  ;;  %p499_p12 = scmp.ge.s32.totalorder %s699_s14, 2 }
   0xf   : > { %s773_s23 = scalar_select %p50_p7, %s687_s11, %s52_s18  }
  0x10   : > { %p775_p11 = por %p131_p10, %p65_p3  ;;  %p528_p13 = scmp.lt.s32.totalorder %s699_s14, 2 }
  0x11   : > { %s151_s25 = sand.u32 1, %s687_s11   ;;  %s515_s27 = sshll.u32 %s695_s13, 3 }
  0x12   : > { %s500_s26 = sshll.u32 %s151_s25, 3  ;;  %s165_s30 = scalar_lea.hbm %s854_s0, %s515_s27 }
  0x13   : > { %s155_s3 = scalar_lea.vmem [#allocation4], %s500_s26  ;;  %s167_s5 = sshll.u32 %s165_s30, 4  ;;  %s168_s5 = int_to_ptr.hbm [resolvable:$true] %s167_s5 }
  0x14   : > { %s169_s4 = sshll.u32 %s155_s3, 4  ;;  %p521_p0 = pnand %p528_p13, %p758_p4  ;;  %s170_s4 = int_to_ptr.vmem [resolvable:$true] %s169_s4 }
  0x15   : > { %p503_p1 = scmp.ge.s32.totalorder %s699_s14, 1  ;;  %p192_p2 = scmp.lt.s32.totalorder %s699_s14, 3 }
  0x16   : > { %s152_s6 = scalar_lea.sflag [#allocation5], %s151_s25 }
  0x17   : > { %523 = dma.hbm_to_vmem [thread:$0]  (!%p521_p0), %s168_s5, 128, %s170_s4, %s152_s6  }
  0x18   : > { %p193_p3 = pnand %p503_p1, %p192_p2 }
  0x19   : > { %s791_s7 = sand.u32 (!%p193_p3), 1, %s683_s10  }
  0x1a   : > { %196 = sbr.rel (%p193_p3) target bundleno = 233 (0xe9), region = 28  ;;  %s504_s8 = sshll.u32 (!%p193_p3), %s791_s7, 3 }
  0x1b   : > { %s199_s15 = scalar_lea.sflag (!%p193_p3), [#allocation5], %s791_s7  ;;  %s202_s16 = scalar_lea.vmem (!%p193_p3), [#allocation4], %s504_s8 }
  0x1f   : > { %670 = dma.done.wait (%p764_p8), %s199_s15, 128  }
  0x20   : > { %672 = vsyncadd (%p764_p8), %s199_s15, 4294967168  ;;  %v701_v0 = vmov 0.0   ;;  %vm265_vm0 = vcmask 1043456   ;;  %v262_v1 = vld [vmem:[%s202_s16] sm:$0xf]  ;;  %p243_p4 = scmp.lt.s32.totalorder %s691_s12, 1  ;;  %v260_v41 = vlaneseq }
  0x21   : > { %258 = vst [vmem:[#allocation2] sm:$0xf] %v701_v0  ;;  %v508_v2 = vld [vmem:[%s202_s16 + $0x4] sm:$0xf]  ;;  %v266_v3 = vsel %vm265_vm0, %v262_v1, -inf  ;;  %s505_s26 = sshll.u32 %s791_s7, 1 }
  0x22   : > { %259 = vst [vmem:[#allocation3] sm:$0xf] %v701_v0  ;;  %v311_v4 = vsel %vm265_vm0, %v508_v2, -inf  ;;  %v267_v5 = vrot.slane %v266_v3, 4  ;;  %s244_s18 = scalar_select %p243_p4, %s691_s12, 1  ;;  %v261_v52 = vshrl.u32 %v260_v41, 7 }
  0x23   : > { %v312_v6 = vrot.slane %v311_v4, 4  ;;  %vm369_vm11 = vcmask 24576   ;;  %s512_s27 = sshll.u32 %s691_s12, 1  ;;  %s234_s28 = scalar_lea.vmem [#allocation7], %s505_s26 }
  0x24   : > { %v268_v7 = vmax.f32 %v266_v3, %v267_v5  ;;  %s506_s19 = sshll.u32 %s244_s18, 1  ;;  %s391_s3 = scalar_lea.hbm %s856_s2, %s512_s27 }
  0x25   : > { %v313_v8 = vmax.f32 %v311_v4, %v312_v6  ;;  %s249_s25 = scalar_lea.vmem %s855_s1, %s506_s19  ;;  %s393_s4 = sshll.u32 %s234_s28, 4  ;;  %s394_s4 = int_to_ptr.vmem [resolvable:$true] %s393_s4 }
  0x26   : > { %v269_v9 = vrot.slane %v268_v7, 2  ;;  %v263_v37 = vld [vmem:[%s249_s25] sm:$0x1]  ;;  %v509_v38 = vld [vmem:[%s249_s25 + $0x1] sm:$0x1]  ;;  %s395_s5 = sshll.u32 %s391_s3, 4  ;;  %s396_s5 = int_to_ptr.hbm [resolvable:$true] %s395_s5 }
  0x27   : > { %v314_v10 = vrot.slane %v313_v8, 2  ;;  %v264_v42 = vunpack.c.0.s8 %v263_v37  ;;  %v310_v45 = vunpack.c.0.s8 %v509_v38  ;;  %s380_s6 = scalar_lea.sflag [#allocation6], %s791_s7  ;;  %s631_s8 = sshra.s32 %s396_s5, 4  ;;  %s632_s8 = int_to_ptr.hbm [resolvable:$true] %s631_s8 }
  0x28   : > { %v270_v11 = vmax.f32 %v268_v7, %v269_v9  ;;  %s633_s15 = scalar_lea.hbm %s632_s8, 2  ;;  %s637_s18 = scalar_lea.hbm %s856_s2, 4 }
  0x29   : > { %v315_v12 = vmax.f32 %v313_v8, %v314_v10  ;;  %v298_v54 = vperm.slane %v264_v42, 0  ;;  %v343_v57 = vperm.slane %v310_v45, 0  ;;  %v351_v10 = vld [vmem:[#allocation2] sm:$0xf]  ;;  %p634_p5 = scmp.ne.s32.totalorder %s632_s8, %s633_s15  ;;  %p638_p8 = scmp.lt.s32.totalorder %s632_s8, %s856_s2 }
  0x2a   : > { %v271_v13 = vrot.slane %v270_v11, 1  ;;  %p639_p10 = scmp.lt.s32.totalorder %s637_s18, %s633_s15 }
  0x2b   : > { %v316_v14 = vrot.slane %v315_v12, 1  ;;  %vm299_vm9 = vcmp.eq.s32.totalorder %v298_v54, %v261_v52  ;;  %vm344_vm10 = vcmp.eq.s32.totalorder %v343_v57, %v261_v52  ;;  %p635_p6 = pnand %p634_p5, %p768_p9 }
  0x2c   : > { %v272_v15 = vmax.f32 %v270_v11, %v271_v13  ;;  %v507_v63 = vsel %vm299_vm9, 1.0, %v701_v0  ;;  %v510_v4 = vsel %vm344_vm10, 1.0, %v701_v0  ;;  %p640_p13 = por %p639_p10, %p638_p8 }
  0x2d   : > { %v317_v16 = vmax.f32 %v315_v12, %v316_v14  ;;  %v354_v12 = vld [vmem:[#allocation3] sm:$0xf]  ;;  %p636_p7 = pneg %p635_p6 }
  0x2e   : > { %v273_v17 = vsub.f32 %v262_v1, %v272_v15 }
  0x2f   : > { %v318_v18 = vsub.f32 %v508_v2, %v317_v16  ;;  %p641_p0 = pnand %p640_p13, %p636_p7 }
  0x30   : > { %v274_v19 = vmul.f32 1.442695, %v273_v17 }
  0x31   : > { %v319_v20 = vmul.f32 1.442695, %v318_v18 }
  0x32   : > { %579 = vpow2.f32 %v274_v19  ;;  %v366_v19 = vand.u32 127, %v260_v41 }
  0x33   : > { %581 = vpow2.f32 %v319_v20 }
  0x38   : > { %v580_v21 = vpop.eup %579 }
  0x39   : > { %v582_v22 = vpop.eup %581  ;;  %v276_v23 = vsel %vm265_vm0, %v580_v21, 0.0 }
  0x3a   : > { %v277_v24 = vrot.slane %v276_v23, 4  ;;  %v321_v25 = vsel %vm265_vm0, %v582_v22, 0.0 }
  0x3b   : > { %v322_v26 = vrot.slane %v321_v25, 4 }
  0x3c   : > { %v278_v27 = vadd.f32 %v277_v24, %v276_v23 }
  0x3d   : > { %v323_v28 = vadd.f32 %v322_v26, %v321_v25 }
  0x3e   : > { %v279_v29 = vrot.slane %v278_v27, 2 }
  0x3f   : > { %v324_v30 = vrot.slane %v323_v28, 2 }
  0x40   : > { %v280_v31 = vadd.f32 %v279_v29, %v278_v27 }
  0x41   : > { %v325_v32 = vadd.f32 %v324_v30, %v323_v28 }
  0x42   : > { %v281_v33 = vrot.slane %v280_v31, 1 }
  0x43   : > { %v326_v34 = vrot.slane %v325_v32, 1 }
  0x44   : > { %v282_v35 = vadd.f32 %v281_v33, %v280_v31 }
  0x45   : > { %v327_v36 = vadd.f32 %v326_v34, %v325_v32 }
  0x46   : > { %583 = vrcp.f32 %v282_v35  ;;  %vm288_vm1 = vweird.f32 %v282_v35  ;;  %v294_v44 = vand.u32 2147483648, %v282_v35  ;;  %v292_v48 = vand.u32 2147483647, %v282_v35 }
  0x47   : > { %585 = vrcp.f32 %v327_v36  ;;  %v339_v49 = vand.u32 2147483648, %v327_v36  ;;  %vm333_vm3 = vweird.f32 %v327_v36  ;;  %v337_v51 = vand.u32 2147483647, %v327_v36 }
  0x48   : > { %v295_v55 = vor.u32 1.1754944e-38, %v294_v44  ;;  %vm293_vm6 = vcmp.eq.f32.partialorder %v292_v48, 8.507059e+37 }
  0x49   : > { %v340_v59 = vor.u32 1.1754944e-38, %v339_v49  ;;  %vm338_vm8 = vcmp.eq.f32.partialorder %v337_v51, 8.507059e+37 }
  0x4c   : > { %v584_v39 = vpop.eup %583 }
  0x4d   : > { %v586_v40 = vpop.eup %585  ;;  %v284_v43 = vmul.f32 %v584_v39, %v282_v35  ;;  %vm289_vm2 = vweird.f32 %v584_v39 }
  0x4e   : > { %v329_v46 = vmul.f32 %v586_v40, %v327_v36  ;;  %vm334_vm4 = vweird.f32 %v586_v40  ;;  %vm290_vm5 = vmor %vm288_vm1, %vm289_vm2 }
  0x4f   : > { %v285_v47 = vsub.f32 1.0, %v284_v43  ;;  %vm335_vm7 = vmor %vm333_vm3, %vm334_vm4 }
  0x50   : > { %v330_v50 = vsub.f32 1.0, %v329_v46 }
  0x51   : > { %v286_v53 = vmul.f32 %v584_v39, %v285_v47 }
  0x52   : > { %v331_v56 = vmul.f32 %v586_v40, %v330_v50 }
  0x53   : > { %v287_v58 = vadd.f32 %v584_v39, %v286_v53 }
  0x54   : > { %v332_v60 = vadd.f32 %v586_v40, %v331_v56 }
  0x55   : > { %v291_v61 = vsel %vm290_vm5, %v584_v39, %v287_v58 }
  0x56   : > { %v296_v62 = vsel %vm293_vm6, %v295_v55, %v291_v61  ;;  %v336_v1 = vsel %vm335_vm7, %v586_v40, %v332_v60 }
  0x57   : > { %v297_v2 = vmul.f32 %v580_v21, %v296_v62  ;;  %v341_v3 = vsel %vm338_vm8, %v340_v59, %v336_v1 }
  0x58   : > { %v342_v5 = vmul.f32 %v582_v22, %v341_v3 }
  0x59   : > { %v300_v6 = vsel %vm299_vm9, %v297_v2, 0.0  ;;  %v304_v7 = vadd.f32 %v507_v63, %v297_v2 }
  0x5a   : > { %v345_v8 = vsel %vm344_vm10, %v342_v5, 0.0  ;;  %v349_v9 = vadd.f32 %v510_v4, %v342_v5 }
  0x5b   : > { %v346_v11 = vadd.f32 %v345_v8, %v300_v6 }
  0x5c   : > { %v350_v13 = vadd.f32 %v349_v9, %v304_v7 }
  0x5d   : > { %v352_v14 = vadd.f32 %v351_v10, %v346_v11 }
  0x5e   : > { %v355_v15 = vadd.f32 %v354_v12, %v350_v13 }
  0x5f   : > { %353 = vst [vmem:[#allocation2] sm:$0xf] %v352_v14 }
  0x60   : > { %356 = vst [vmem:[#allocation3] sm:$0xf] %v355_v15 }
  0x66   : > { %v360_v16 = vld [vmem:[#allocation2] sm:$0xf] }
  0x67   : > { %v361_v17 = vsel %vm265_vm0, %v360_v16, 0.0  ;;  %v371_v0 = vld [vmem:[#allocation3] sm:$0xf] }
  0x68   : > { %362 = vadd.xlane.f32.xlu0 %v361_v17  ;;  %v372_v18 = vsel %vm265_vm0, %v371_v0, 0.0 }
  0x70   : > { %373 = vadd.xlane.f32.xlu0 %v372_v18 }
  0xdb   : > { %v363_v20 = vpop.xlane.xlu0 %362 }
  0xdc   : > { %v367_v21 = vperm.slane %v363_v20, %v366_v19 }
  0xde   : > { %370 = vst.msk [vmem:[%s234_s28] sm:$0x1] %vm369_vm11, %v367_v21 }
  0xe3   : > { %v374_v22 = vpop.xlane.xlu0 %373 }
  0xe4   : > { %v376_v23 = vperm.slane %v374_v22, %v366_v19 }
  0xe6   : > { %378 = vst.msk [vmem:[%s234_s28 + $0x1] sm:$0x1] %vm369_vm11, %v376_v23 }
  0xe7   : > { %644 = shalt.err (!%p641_p0)
}
  0xe8   : > { %518 = dma.vmem_to_hbm [thread:$0]  (%p768_p9), %s394_s4, 32, %s396_s5, %s380_s6  }
  0xe9 PF: > { %s407_s7 = sand.u32 1, %s679_s9   ;;  %p525_p1 = pnand %p499_p12, %p775_p11 }
  0xea   : > { %s408_s21 = scalar_lea.sflag [#allocation6], %s407_s7 }
  0xeb   : > { %p526_p2 = pneg %p525_p1 }
  0xed   : > { %674 = dma.done.wait (%p526_p2), %s408_s21, 32  }
  0xee   : > { %676 = vsyncadd (%p526_p2), %s408_s21, 4294967264  ;;  %s18_s14 = sadd.s32 1, %s699_s14   ;;  %s861_s9 = smov %s683_s10 }
  0xef   : > { %p15_p3 = scmp.ge.s32.totalorder %s18_s14, 4   ;;  %s862_s10 = smov %s687_s11 }
  0xf0   : > { %s863_s11 = smov %s773_s23  ;;  %s864_s12 = smov %s695_s13 }
  0xf1   : > { %s865_s13 = smov %s867_s17  ;;  %17 = sbr.rel (!%p15_p3) target bundleno = 6 (0x6), region = 86 }
  0xf6   :  { %414 = vsyncpa [#allocation5], 1 }
  0xf7   :  { %416 = vsyncpa [#allocation5 + $0x1], 1 }
  0xf8   :  { %417 = vsyncpa [#allocation6], 1 }
  0xf9   :  { %419 = vsyncpa [#allocation6 + $0x1], 1 }

</bundles_post_ra>
